<compile_context>
chip_gen: v7x
topology: tpu7x:2x2x1
jax: 0.10.0
libtpu: 0.0.40
codegen_flags: <defaults>
</compile_context>

<pallas_src>
import functools

import jax
import jax.numpy as jnp
from jax.experimental import pallas as pl
from jax.experimental.pallas import tpu as pltpu


_MAX_ROW_TILE = 512                    # multiple of 8 (sublane) and 128 (lane)
_VMEM_LIMIT_BYTES = 32 * 1024 * 1024   # fits scoped VMEM on v5e/v6e/v7x


def _row_tile(n: int) -> int:
    """Row tile: full extent when small, else a 512-row (8/128-aligned) tile."""
    return n if n <= _MAX_ROW_TILE else _MAX_ROW_TILE


def _mlp_block(x, w1, b1, w2, b2, mm_dtype):
    """tanh(x @ W1 + b1) @ W2 + b2 on VMEM tiles.

    Matmul operands are cast to `mm_dtype` (bf16 fast path); accumulation
    (preferred_element_type), bias adds and tanh stay in f32.
    """
    h = jnp.tanh(
        jnp.dot(x.astype(mm_dtype), w1.astype(mm_dtype),
                preferred_element_type=jnp.float32)
        + b1
    )
    return (
        jnp.dot(h.astype(mm_dtype), w2.astype(mm_dtype),
                preferred_element_type=jnp.float32)
        + b2
    )


def _contract_p(b, t, mm_dtype):
    """out[i, j] = sum_p b[i, p] * t[j, p]  (== b @ t.T, no explicit transpose)."""
    return jax.lax.dot_general(
        b.astype(mm_dtype), t.astype(mm_dtype),
        dimension_numbers=(((1,), (1,)), ((), ())),
        preferred_element_type=jnp.float32,
    )


# ----------------------------------------------------------------------------
# Kernels
# ----------------------------------------------------------------------------
def _mlp_kernel(x_ref, w1_ref, b1_ref, w2_ref, b2_ref, o_ref, *, mm_dtype):
    o_ref[...] = _mlp_block(
        x_ref[...], w1_ref[...], b1_ref[...], w2_ref[...], b2_ref[...],
        mm_dtype,
    ).astype(o_ref.dtype)


def _fused_trunk2d_kernel(b_ref, x_ref, w1_ref, b1_ref, w2_ref, b2_ref, o_ref,
                          *, mm_dtype):
    # Trunk MLP on this row tile fused with the DeepONet combine: the (tn, P)
    # trunk features never leave VMEM.
    t = _mlp_block(x_ref[...], w1_ref[...], b1_ref[...], w2_ref[...],
                   b2_ref[...], mm_dtype)                       # (tn, P) f32
    o_ref[...] = _contract_p(b_ref[...], t, mm_dtype).astype(o_ref.dtype)


def _fused_trunk3d_kernel(b_ref, x_ref, w1_ref, b1_ref, w2_ref, b2_ref, o_ref,
                          *, mm_dtype):
    # Grid = (num_point_tiles, batch); batch is the inner ("arbitrary") axis,
    # so the (B, tn) output block stays resident while each step writes the
    # single row belonging to batch index `bi`.
    bi = pl.program_id(1)
    t = _mlp_block(x_ref[0], w1_ref[...], b1_ref[...], w2_ref[...],
                   b2_ref[...], mm_dtype)                       # (tn, P) f32
    b_row = b_ref[pl.ds(bi, 1), :]                              # (1, P)
    row = _contract_p(b_row, t, mm_dtype)                       # (1, tn) on MXU
    o_ref[pl.ds(bi, 1), :] = row.astype(o_ref.dtype)


# ----------------------------------------------------------------------------
# Wrappers
# ----------------------------------------------------------------------------
def _mlp_forward(x, params, mm_dtype):
    """Row-tiled, auto-pipelined 2-layer tanh MLP: (M, d_in) -> (M, P)."""
    w1, b1, w2, b2 = params
    m, d_in = x.shape
    hidden = w1.shape[1]
    p = w2.shape[1]
    tm = _row_tile(m)
    resident = lambda i: (0, 0)
    return pl.pallas_call(
        functools.partial(_mlp_kernel, mm_dtype=mm_dtype),
        out_shape=jax.ShapeDtypeStruct((m, p), jnp.float32),
        grid_spec=pltpu.PrefetchScalarGridSpec(
            num_scalar_prefetch=0,
            grid=(pl.cdiv(m, tm),),
            in_specs=[
                pl.BlockSpec((tm, d_in), lambda i: (i, 0)),     # rows: pipelined
                pl.BlockSpec((d_in, hidden), resident),         # weights: resident
                pl.BlockSpec((1, hidden), resident),
                pl.BlockSpec((hidden, p), resident),
                pl.BlockSpec((1, p), resident),
            ],
            out_specs=pl.BlockSpec((tm, p), lambda i: (i, 0)),
        ),
        compiler_params=pltpu.CompilerParams(
            dimension_semantics=("parallel",),      # shards across v7x's 2 TCs
            vmem_limit_bytes=_VMEM_LIMIT_BYTES,
        ),
    )(x, w1, b1, w2, b2)


def deeponet_forward(branch_params, trunk_params, branch_input, trunk_input,
                     mm_dtype=jnp.bfloat16):
    tw1, tb1, tw2, tb2 = trunk_params
    trunk_dim, hidden = tw1.shape
    p = tw2.shape[1]

    # Branch net (small): one pipelined MLP call; its (B, P) output is then
    # held resident in VMEM by the fused trunk+combine kernel below.
    b = _mlp_forward(branch_input, branch_params, mm_dtype)     # (B, P)
    batch_s = b.shape[0]

    resident = lambda *_: (0, 0)

    if trunk_input.ndim == 2:
        n = trunk_input.shape[0]
        tn = _row_tile(n)
        out = pl.pallas_call(
            functools.partial(_fused_trunk2d_kernel, mm_dtype=mm_dtype),
            out_shape=jax.ShapeDtypeStruct((batch_s, n), jnp.float32),
            grid_spec=pltpu.PrefetchScalarGridSpec(
                num_scalar_prefetch=0,
                grid=(pl.cdiv(n, tn),),
                in_specs=[
                    pl.BlockSpec((batch_s, p), resident),             # b resident
                    pl.BlockSpec((tn, trunk_dim), lambda i: (i, 0)),  # trunk rows
                    pl.BlockSpec((trunk_dim, hidden), resident),
                    pl.BlockSpec((1, hidden), resident),
                    pl.BlockSpec((hidden, p), resident),
                    pl.BlockSpec((1, p), resident),
                ],
                out_specs=pl.BlockSpec((batch_s, tn), lambda i: (0, i)),
            ),
            compiler_params=pltpu.CompilerParams(
                dimension_semantics=("parallel",),
                vmem_limit_bytes=_VMEM_LIMIT_BYTES,
            ),
        )(b, trunk_input, tw1, tb1, tw2, tb2)

    elif trunk_input.ndim == 3:
        bs, n, tdim = trunk_input.shape
        if bs != batch_s:
            raise ValueError("branch/trunk batch size mismatch")
        tn = _row_tile(n)
        out = pl.pallas_call(
            functools.partial(_fused_trunk3d_kernel, mm_dtype=mm_dtype),
            out_shape=jax.ShapeDtypeStruct((batch_s, n), jnp.float32),
            grid_spec=pltpu.PrefetchScalarGridSpec(
                num_scalar_prefetch=0,
                grid=(pl.cdiv(n, tn), batch_s),   # batch innermost: output block resident
                in_specs=[
                    pl.BlockSpec((batch_s, p), resident),                     # b resident
                    pl.BlockSpec((1, tn, tdim), lambda ni, bi: (bi, ni, 0)),  # trunk rows
                    pl.BlockSpec((tdim, hidden), resident),
                    pl.BlockSpec((1, hidden), resident),
                    pl.BlockSpec((hidden, p), resident),
                    pl.BlockSpec((1, p), resident),
                ],
                out_specs=pl.BlockSpec((batch_s, tn), lambda ni, bi: (0, ni)),
            ),
            compiler_params=pltpu.CompilerParams(
                dimension_semantics=("parallel", "arbitrary"),
                vmem_limit_bytes=_VMEM_LIMIT_BYTES,
            ),
        )(b, trunk_input, tw1, tb1, tw2, tb2)
    else:
        raise ValueError(f"Unsupported trunk_input ndim: {trunk_input.ndim}")
    return out


# ----------------------------------------------------------------------------
# Pure-JAX reference + demo
# ----------------------------------------------------------------------------
def _mlp_ref(x, params):
    w1, b1, w2, b2 = params
    return jnp.tanh(x @ w1 + b1) @ w2 + b2


def _deeponet_ref(branch_params, trunk_params, branch_input, trunk_input):
    b = _mlp_ref(branch_input, branch_params)
    if trunk_input.ndim == 2:
        t = _mlp_ref(trunk_input, trunk_params)
        return b @ t.T
    batch_s, num_points, dcoord = trunk_input.shape
    t = _mlp_ref(trunk_input.reshape(batch_s * num_points, dcoord), trunk_params)
    t = t.reshape(batch_s, num_points, -1)
    return jnp.sum(b[:, None, :] * t, axis=-1)


def _init_mlp(key, d_in, hidden, d_out):
    k1, k2 = jax.random.split(key)
    w1 = jax.random.normal(k1, (d_in, hidden), jnp.float32) * (1.0 / jnp.sqrt(d_in))
    b1 = jnp.zeros((1, hidden), jnp.float32)
    w2 = jax.random.normal(k2, (hidden, d_out), jnp.float32) * (1.0 / jnp.sqrt(hidden))
    b2 = jnp.zeros((1, d_out), jnp.float32)
    return (w1, b1, w2, b2)


if __name__ == "__main__":
    key = jax.random.PRNGKey(0)
    k_branch, k_trunk, k_bx, k_tx2, k_tx3 = jax.random.split(key, 5)

    # Small shapes consistent with the module's forward pass.
    B = 2            # batch size
    branch_dim = 16  # branch sensor dimension
    trunk_dim = 2    # trunk coordinate dimension
    hidden = 32
    P = 32           # latent basis dimension
    N = 8            # number of query points

    branch_params = _init_mlp(k_branch, branch_dim, hidden, P)
    trunk_params = _init_mlp(k_trunk, trunk_dim, hidden, P)

    branch_input = jax.random.normal(k_bx, (B, branch_dim), jnp.float32)
    trunk_input_2d = jax.random.normal(k_tx2, (N, trunk_dim), jnp.float32)
    trunk_input_3d = jax.random.normal(k_tx3, (B, N, trunk_dim), jnp.float32)

    ref2d = _deeponet_ref(branch_params, trunk_params, branch_input, trunk_input_2d)
    ref3d = _deeponet_ref(branch_params, trunk_params, branch_input, trunk_input_3d)

    # f32 MXU-operand path: validates fused-kernel structure against the reference.
    out2d_f32 = jax.block_until_ready(deeponet_forward(
        branch_params, trunk_params, branch_input, trunk_input_2d,
        mm_dtype=jnp.float32))
    out3d_f32 = jax.block_until_ready(deeponet_forward(
        branch_params, trunk_params, branch_input, trunk_input_3d,
        mm_dtype=jnp.float32))
    assert out2d_f32.shape == (B, N) and out3d_f32.shape == (B, N)
    assert jnp.allclose(out2d_f32, ref2d, atol=1e-3, rtol=1e-3)
    assert jnp.allclose(out3d_f32, ref3d, atol=1e-3, rtol=1e-3)

    # Default bf16 MXU fast path: loosened tolerance vs. the f32 reference.
    out2d = jax.block_until_ready(deeponet_forward(
        branch_params, trunk_params, branch_input, trunk_input_2d))
    out3d = jax.block_until_ready(deeponet_forward(
        branch_params, trunk_params, branch_input, trunk_input_3d))
    assert out2d.shape == (B, N) and out3d.shape == (B, N)
    assert jnp.allclose(out2d, ref2d, atol=1e-1, rtol=1e-1)
    assert jnp.allclose(out3d, ref3d, atol=1e-1, rtol=1e-1)

    print("KERNEL_OK")
</pallas_src>

<mosaic_0001>
module attributes {stable_mosaic.version = 11 : i64} {
  func.func @_mlp_kernel(%arg0: i32, %arg1: memref<2x16xf32, #tpu.memory_space<vmem>>, %arg2: memref<16x32xf32, #tpu.memory_space<vmem>>, %arg3: memref<1x32xf32, #tpu.memory_space<vmem>>, %arg4: memref<32x32xf32, #tpu.memory_space<vmem>>, %arg5: memref<1x32xf32, #tpu.memory_space<vmem>>, %arg6: memref<2x32xf32, #tpu.memory_space<vmem>>) attributes {dimension_semantics = [#tpu.dimension_semantics<parallel>], iteration_bounds = array<i64: 1>, scalar_prefetch = 0 : i64, scratch_operands = 0 : i64, tpu.core_type = #tpu.core_type<tc>, window_params = [{transform_indices = @transform_0, window_bounds = array<i64: 2, 16>}, {pipeline_mode = #tpu.pipeline_mode<synchronous>, transform_indices = @transform_1, window_bounds = array<i64: 16, 32>}, {pipeline_mode = #tpu.pipeline_mode<synchronous>, transform_indices = @transform_2, window_bounds = array<i64: 1, 32>}, {pipeline_mode = #tpu.pipeline_mode<synchronous>, transform_indices = @transform_3, window_bounds = array<i64: 32, 32>}, {pipeline_mode = #tpu.pipeline_mode<synchronous>, transform_indices = @transform_4, window_bounds = array<i64: 1, 32>}, {transform_indices = @transform_5, window_bounds = array<i64: 2, 32>}]} {
    %c0 = arith.constant 0 : index
    %c0_0 = arith.constant 0 : index
    %0 = vector.load %arg1[%c0, %c0_0] : memref<2x16xf32, #tpu.memory_space<vmem>>, vector<2x16xf32>
    %c0_1 = arith.constant 0 : index
    %c0_2 = arith.constant 0 : index
    %1 = vector.load %arg2[%c0_1, %c0_2] : memref<16x32xf32, #tpu.memory_space<vmem>>, vector<16x32xf32>
    %c0_3 = arith.constant 0 : index
    %c0_4 = arith.constant 0 : index
    %2 = vector.load %arg3[%c0_3, %c0_4] : memref<1x32xf32, #tpu.memory_space<vmem>>, vector<1x32xf32>
    %c0_5 = arith.constant 0 : index
    %c0_6 = arith.constant 0 : index
    %3 = vector.load %arg4[%c0_5, %c0_6] : memref<32x32xf32, #tpu.memory_space<vmem>>, vector<32x32xf32>
    %c0_7 = arith.constant 0 : index
    %c0_8 = arith.constant 0 : index
    %4 = vector.load %arg5[%c0_7, %c0_8] : memref<1x32xf32, #tpu.memory_space<vmem>>, vector<1x32xf32>
    %cst = arith.constant dense<0.000000e+00> : vector<2x32xf32>
    %5 = tpu.matmul %0, %1, %cst {dimension_numbers = #tpu.dot_dimension_numbers<[1], [0], [0], [1], [0, 0, 1, 1], [], []>} : vector<2x16xf32>, vector<16x32xf32>, vector<2x32xf32> -> vector<2x32xf32>
    %6 = vector.broadcast %2 : vector<1x32xf32> to vector<2x32xf32>
    %7 = arith.addf %5, %6 : vector<2x32xf32>
    %8 = math.tanh %7 : vector<2x32xf32>
    %cst_9 = arith.constant dense<0.000000e+00> : vector<2x32xf32>
    %9 = tpu.matmul %8, %3, %cst_9 {dimension_numbers = #tpu.dot_dimension_numbers<[1], [0], [0], [1], [0, 0, 1, 1], [], []>} : vector<2x32xf32>, vector<32x32xf32>, vector<2x32xf32> -> vector<2x32xf32>
    %10 = vector.broadcast %4 : vector<1x32xf32> to vector<2x32xf32>
    %11 = arith.addf %9, %10 : vector<2x32xf32>
    %c0_10 = arith.constant 0 : index
    %c0_11 = arith.constant 0 : index
    %12 = vector.load %arg6[%c0_10, %c0_11] : memref<2x32xf32, #tpu.memory_space<vmem>>, vector<2x32xf32>
    tpu.vector_store %arg6[%c0_10, %c0_11], %11 {strides = array<i32>} : memref<2x32xf32, #tpu.memory_space<vmem>>, vector<2x32xf32>,
    return
  }
  func.func @transform_0(%arg0: i32) -> (i32, i32) {
    %c0_i32 = arith.constant 0 : i32
    %c0_i32_0 = arith.constant 0 : i32
    return %arg0, %c0_i32 : i32, i32
  }
  func.func @transform_1(%arg0: i32) -> (i32, i32) {
    %c0_i32 = arith.constant 0 : i32
    %c0_i32_0 = arith.constant 0 : i32
    %c0_i32_1 = arith.constant 0 : i32
    return %c0_i32, %c0_i32_0 : i32, i32
  }
  func.func @transform_2(%arg0: i32) -> (i32, i32) {
    %c0_i32 = arith.constant 0 : i32
    %c0_i32_0 = arith.constant 0 : i32
    %c0_i32_1 = arith.constant 0 : i32
    return %c0_i32, %c0_i32_0 : i32, i32
  }
  func.func @transform_3(%arg0: i32) -> (i32, i32) {
    %c0_i32 = arith.constant 0 : i32
    %c0_i32_0 = arith.constant 0 : i32
    %c0_i32_1 = arith.constant 0 : i32
    return %c0_i32, %c0_i32_0 : i32, i32
  }
  func.func @transform_4(%arg0: i32) -> (i32, i32) {
    %c0_i32 = arith.constant 0 : i32
    %c0_i32_0 = arith.constant 0 : i32
    %c0_i32_1 = arith.constant 0 : i32
    return %c0_i32, %c0_i32_0 : i32, i32
  }
  func.func @transform_5(%arg0: i32) -> (i32, i32) {
    %c0_i32 = arith.constant 0 : i32
    %c0_i32_0 = arith.constant 0 : i32
    return %arg0, %c0_i32 : i32, i32
  }
}

</mosaic_0001>

<bundles_post_ra>
// kernel: tpu_custom_call.1
= control target key start
LH: loop header
LB: loop body
LE: loop exit
PB: predicated region body
PF: predicated region fallthrough
CT: control target
= control target key end

     0   :  { %10 = vsyncpa [#allocation3], 0  ;;  %s491_s0 = inlined_call_operand.hbm [shape: f32[2,16], index: 0, kind: input, shape index: {}]   ;;  %s492_s1 = inlined_call_operand.hbm [shape: f32[16,32], index: 1, kind: input, shape index: {}]   ;;  %s493_s2 = inlined_call_operand.vmem [shape: f32[1,32], index: 2, kind: input, shape index: {}]   ;;  %s494_s3 = inlined_call_operand.hbm [shape: f32[32,32], index: 3, kind: input, shape index: {}]   ;;  %s495_s4 = inlined_call_operand.vmem [shape: f32[1,32], index: 4, kind: input, shape index: {}]   ;;  %s496_s5 = inlined_call_operand.hbm [shape: f32[2,32], index: 5, kind: output, shape index: {}]  }
   0x1   :  { %11 = vsyncpa [#allocation6], 0 }
   0x2   :  { %12 = vsyncpa [#allocation4], 0  ;;  %s392_s18 = smov [#allocation5]   ;;  %s298_s22 = scalar_lea.hbm %s492_s1, 256 }
   0x3   :  { %s28_s19 = sshll.u32 %s392_s18, 4  ;;  %p299_p0 = scmp.ne.s32.totalorder %s492_s1, %s298_s22  ;;  %s29_s19 = int_to_ptr.vmem [resolvable:$true] %s28_s19 }
   0x4   :  { %p302_p1 = scmp.lt.u32.totalorder %s298_s22, %s492_s1 }
   0x6   :  { %p304_p2 = pnand %p302_p1, %p299_p0 }
   0x8   :  { %307 = shalt.err (!%p304_p2)
}
   0x9   :  { %s308_s27 = scalar_lea.vmem %s29_s19, 256  ;;  %p313_p4 = scmp.lt.s32.totalorder %s29_s19, %s29_s19 }
   0xa   :  { %p309_p3 = scmp.ne.s32.totalorder %s29_s19, %s308_s27  ;;  %p314_p5 = scmp.lt.s32.totalorder %s308_s27, %s308_s27 }
   0xc   :  { %p315_p6 = por %p314_p5, %p313_p4 }
   0xe   :  { %p316_p7 = pnand %p315_p6, %p309_p3 }
  0x10   :  { %319 = shalt.err (!%p316_p7)
}
  0x11   :  { %s393_s28 = smov 128   ;;  %s394_s29 = smov 8  }
  0x12   :  { %34 = dma.hbm_to_vmem [thread:$0]  %s492_s1, 256, %s29_s19, [#allocation6], %s393_s28, %s393_s28, %s394_s29  }
  0x13   :  { %s395_s7 = smov [#allocation2]   ;;  %s396_s9 = smov [#allocation7]  }
  0x14   :  { %s19_s8 = sshll.u32 %s395_s7, 4  ;;  %s42_s10 = sshll.u32 %s396_s9, 4  ;;  %s20_s8 = int_to_ptr.vmem [resolvable:$true] %s19_s8  ;;  %s43_s10 = int_to_ptr.vmem [resolvable:$true] %s42_s10 }
  0x15   :  { %s320_s13 = scalar_lea.hbm %s491_s0, 32 }
  0x16   :  { %p321_p8 = scmp.ne.s32.totalorder %s491_s0, %s320_s13  ;;  %p324_p9 = scmp.lt.u32.totalorder %s320_s13, %s491_s0 }
  0x18   :  { %p326_p10 = pnand %p324_p9, %p321_p8 }
  0x1a   :  { %329 = shalt.err (!%p326_p10)
}
  0x1b   :  { %s330_s1 = scalar_lea.vmem %s20_s8, 32  ;;  %p335_p12 = scmp.lt.s32.totalorder %s20_s8, %s20_s8 }
  0x1c   :  { %p331_p11 = scmp.ne.s32.totalorder %s20_s8, %s330_s1  ;;  %p336_p13 = scmp.lt.s32.totalorder %s330_s1, %s330_s1 }
  0x1e   :  { %p337_p0 = por %p336_p13, %p335_p12 }
  0x20   :  { %p338_p1 = pnand %p337_p0, %p331_p11 }
  0x22   :  { %341 = shalt.err (!%p338_p1)
}
  0x23   :  { %22 = dma.hbm_to_vmem [thread:$0]  %s491_s0, 32, %s20_s8, [#allocation3]  }
  0x24   :  { %s342_s22 = scalar_lea.hbm %s494_s3, 512 }
  0x25   :  { %p343_p2 = scmp.ne.s32.totalorder %s494_s3, %s342_s22  ;;  %p346_p3 = scmp.lt.u32.totalorder %s342_s22, %s494_s3 }
  0x27   :  { %p348_p4 = pnand %p346_p3, %p343_p2 }
  0x29   :  { %351 = shalt.err (!%p348_p4)
}
  0x2a   :  { %s352_s27 = scalar_lea.vmem %s43_s10, 512  ;;  %p357_p6 = scmp.lt.s32.totalorder %s43_s10, %s43_s10 }
  0x2b   :  { %p353_p5 = scmp.ne.s32.totalorder %s43_s10, %s352_s27  ;;  %p358_p7 = scmp.lt.s32.totalorder %s352_s27, %s352_s27 }
  0x2d   :  { %p359_p8 = por %p358_p7, %p357_p6 }
  0x2f   :  { %p360_p9 = pnand %p359_p8, %p353_p5 }
  0x31   :  { %363 = shalt.err (!%p360_p9)
}
  0x32   :  { %48 = dma.hbm_to_vmem [thread:$0]  %s494_s3, 512, %s43_s10, [#allocation6], %s393_s28, %s393_s28, %s394_s29  }
  0x33   :  { %386 = dma.done.wait [#allocation3], 32  }
  0x34   :  { %387 = vsyncadd [#allocation3], 4294967264 }
  0x35   :  { %388 = dma.done.wait [#allocation6], 768  }
  0x36   :  { %389 = vsyncadd [#allocation6], 4294966528  ;;  %v397_v0 = vmov 0.0|0.0   ;;  %vm398_vm0 = vmmov 0   ;;  %v399_v1 = vmov 0.0   ;;  %v61_v2 = vld [vmem:[#allocation5] sm:$0xff] }
  0x37   :  { %278 = vmatprep.subr.bf16.mxu0 %v397_v0  ;;  %264 = vmatprep.mubr.msk.f32.mxu0 %vm398_vm0, %v399_v1  ;;  %v62_v3 = vld [vmem:[#allocation5 + $0x8] sm:$0xff]  ;;  %v60_v5 = vld [vmem:[#allocation2] sm:$0x3]  ;;  %vm75_vm1 = vcmask 130048   ;;  %v64_v6 = vld [vmem:[#allocation7] sm:$0xff]  ;;  %vm156_vm2 = vcmask 261120  }
  0x38   :  { %281 = vmatprep.subr.bf16.mxu1 %v397_v0  ;;  %275 = vmatprep.mubr.msk.f32.mxu1 %vm398_vm0, %v399_v1  ;;  %v279_v4 = vpack.c.bf16 %v62_v3, %v61_v2  ;;  %v65_v7 = vld [vmem:[#allocation7 + $0x8] sm:$0xff]  ;;  %v66_v8 = vld [vmem:[#allocation7 + $0x10] sm:$0xff]  ;;  %v67_v10 = vld [vmem:[#allocation7 + $0x18] sm:$0xff]  ;;  %s400_s7 = smov [#allocation8]   ;;  %vm230_vm3 = vcmask 254976  }
  0x39   :  { %v282_v9 = vpack.c.bf16 %v65_v7, %v64_v6  ;;  %v285_v11 = vpack.c.bf16 %v67_v10, %v66_v8  ;;  %v248_v12 = vld [vmem:[%s493_s2] ss:$0 sm:$0xff]  ;;  %s238_s8 = sshll.u32 %s400_s7, 4  ;;  %s239_s8 = int_to_ptr.vmem [resolvable:$true] %s238_s8 }
  0x3a   :  { %280 = vmatpush3.bf16.msra.mxu0 %v279_v4  ;;  %v250_v17 = vld [vmem:[%s495_s4] ss:$0 sm:$0xff]  ;;  %s364_s2 = scalar_lea.vmem %s239_s8, 32  ;;  %p369_p11 = scmp.lt.s32.totalorder %s239_s8, %s239_s8 }
  0x3b   :  { %283 = vmatpush3.bf16.msra.mxu1 %v282_v9  ;;  %p365_p10 = scmp.ne.s32.totalorder %s239_s8, %s364_s2  ;;  %p370_p12 = scmp.lt.s32.totalorder %s364_s2, %s364_s2 }
  0x3c   :  { %284 = vmatprep.subr.bf16.mxu1 %v397_v0 }
  0x3d   :  { %265 = vmatmul.mubr.msk.f32.vlgmr.msra.gmra.mrb[0].mxu0 %vm75_vm1, %v60_v5  ;;  %p371_p13 = por %p370_p12, %p369_p11 }
  0x3f   :  { %286 = vmatpush3.bf16.msra.mxu1 %v285_v11  ;;  %p372_p0 = pnand %p371_p13, %p365_p10 }
 0x110   :  { %v145_v13 = vpop.f32.mrb[0].mxu0 }
 0x111   :  { %v146_v14 = vadd.f32 %v248_v12, %v145_v13  ;;  %v266_v15 = vpop.f32.mrb[1].mxu0 }
 0x113   :  { %296 = vtanh.f32 %v146_v14 }
 0x11d   :  { %v297_v16 = vpop.eup %296 }
 0x11e   :  { %276 = vmatmul.mubr.msk.f32.vlgmr.msra.gmra.mrb[0].mxu1 %vm156_vm2, %v297_v16 }
 0x1f1   :  { %v226_v18 = vpop.f32.mrb[0].mxu1 }
 0x1f2   :  { %v227_v19 = vadd.f32 %v250_v17, %v226_v18  ;;  %v277_v20 = vpop.f32.mrb[1].mxu1 }
 0x1f4   :  { %231 = vst.msk [vmem:[#allocation8] sm:$0x3] %vm230_vm3, %v227_v19 }
 0x1f5   :  { %375 = shalt.err (!%p372_p0)
}
 0x1f6   :  { %s376_s11 = scalar_lea.hbm %s496_s5, 32 }
 0x1f7   :  { %p377_p1 = scmp.ne.s32.totalorder %s496_s5, %s376_s11  ;;  %p380_p2 = scmp.lt.u32.totalorder %s376_s11, %s496_s5 }
 0x1f9   :  { %p382_p3 = pnand %p380_p2, %p377_p1 }
 0x1fb   :  { %385 = shalt.err (!%p382_p3)
}
 0x1fc   :  { %241 = dma.vmem_to_hbm [thread:$0]  %s239_s8, 32, %s496_s5, [#allocation4]  }
 0x1fd   :  { %390 = dma.done.wait [#allocation4], 32  }
 0x1fe   :  { %391 = vsyncadd [#allocation4], 4294967264 }
 0x1ff   :  { %245 = vsyncpa [#allocation3], 1 }
 0x200   :  { %246 = vsyncpa [#allocation6], 1 }
 0x201   :  { %247 = vsyncpa [#allocation4], 1 }

</bundles_post_ra>
